<compile_context>
chip_gen: v6e
topology: v6e:2x2x1
jax: 0.10.0
libtpu: 0.0.40
codegen_flags: <defaults>
</compile_context>

<pallas_src>
import functools

import jax
import jax.numpy as jnp
from jax.experimental import pallas as pl
from jax.experimental.pallas import tpu as pltpu

# ---- data config (mirrors get_data_config(), small shapes) ------------------
BATCH_SIZE = 2
N_OF_CH = 4
IMAGE_SIZE = 16

PATCH = 4                       # synthetic backbone downsample factor
FEAT_CH = 32                    # synthetic backbone feature channels
H1 = W1 = IMAGE_SIZE // PATCH   # backbone spatial output (4 x 4)
HW = H1 * W1                    # 16
N_TRANSFORM_PARAMS = 8          # synthetic transform head output size
OUT_W = 128                     # lane-dense packed output width


# =============================================================================
# Fused forward kernel: everything lives in VMEM, single invocation (grid=()).
#   p_ref     : (2*B*HW, C*P*P) bf16  stacked patches; x1 rows (w,h)-ordered,
#                                     x2 rows (h,w)-ordered (matches einsum/view)
#   xcat_ref  : (B, 2*C*H*W)    bf16  flattened concat([x1, x2], dim=1)
#   bbw/bbb   : backbone linear (C*P*P, F) bf16, (1, F) f32
#   trw_t/trb : transform head  (8, 2*C*H*W) bf16 (transposed, UN-padded), (1,8) f32
#   fmw/fmb   : matcher head    (HW, HW) f32, (1, 1) f32
#   out_ref   : (B, 128) f32    cols 0..7 = transform_pred, col 8 = match_prob
# =============================================================================
def _fused_kernel(p_ref, xcat_ref, bbw_ref, bbb_ref, trw_t_ref, trb_ref,
                  fmw_ref, fmb_ref, out_ref, *, norm_feature, batch):
    eps = 1e-6
    n_t = N_TRANSFORM_PARAMS

    # ---- backbone projection for x1 AND x2 patches: one bf16 MXU matmul -----
    f = jnp.dot(p_ref[...], bbw_ref[...],
                preferred_element_type=jnp.float32)          # (2*B*HW, F) f32
    f = jnp.maximum(f + bbb_ref[...], 0.0)

    # ---- feature_l2_norm over channel dim (eps outside sqrt, as in torch) ---
    if norm_feature:
        f = f / (jnp.sqrt(jnp.sum(f * f, axis=-1, keepdims=True)) + eps)

    f_c = f.astype(jnp.bfloat16)                             # bf16 MXU operands

    fmw = fmw_ref[...]                                       # (HW, HW) f32
    w32 = trw_t_ref[...].astype(jnp.float32)                 # (8, 2048) f32
    # identity matrix used to move an (8,1) sublane column into a (1,8) lane
    # row with only broadcast/multiply/reduce (no tiny transpose relayouts).
    eye = (jax.lax.broadcasted_iota(jnp.int32, (n_t, n_t), 0)
           == jax.lax.broadcasted_iota(jnp.int32, (n_t, n_t), 1)
           ).astype(jnp.float32)

    # single lane-dense zero init of the packed output slab
    out_ref[...] = jnp.zeros((batch, OUT_W), jnp.float32)

    for b in range(batch):                                   # static unroll, B=2
        # ---- correlation for batch b: one clean (HW,F)@(HW,F)^T MXU dot -----
        # corr[r, c] with r = w*h1 + h and c = x*w2 + y, i.e. exactly
        # einsum('bfhw,bfxy->bwhxy').view(b, h1*w1, h2*w2)
        s_b = f_c[b * HW:(b + 1) * HW, :]                            # (HW, F)
        t_b = f_c[(batch + b) * HW:(batch + b + 1) * HW, :]          # (HW, F)
        cb = jnp.einsum("rf,cf->rc", s_b, t_b,
                        preferred_element_type=jnp.float32)          # (HW, HW)

        # ---- feature_l2_norm(relu(corr)) over dim=1 (the h1*w1 axis) --------
        if norm_feature:
            cb = jnp.maximum(cb, 0.0)
            cb = cb / (jnp.sqrt(jnp.sum(cb * cb, axis=0, keepdims=True)) + eps)

        # ---- matcher head: flatten + linear + sigmoid == <corr, W> + bias ---
        acc = jnp.sum(cb * fmw, axis=1, keepdims=True)               # (HW, 1)
        logit = jnp.sum(acc, axis=0, keepdims=True) + fmb_ref[...]   # (1, 1)
        out_ref[b:b + 1, n_t:n_t + 1] = jax.nn.sigmoid(logit)        # col 8

        # ---- transform head row: VPU multiply + lane reduce (skip the MXU) --
        xb = xcat_ref[b:b + 1, :].astype(jnp.float32)                # (1, 2048)
        col = jnp.sum(w32 * xb, axis=-1, keepdims=True)              # (8, 1)
        row = jnp.sum(col * eye, axis=0, keepdims=True) + trb_ref[...]  # (1, 8)
        out_ref[b:b + 1, 0:n_t] = row                                # cols 0..7


# =============================================================================
# Wrapper: layout plumbing in XLA (patchify / flatten / bf16 cast), one
# pallas_call with grid=() and whole-array VMEM blocks (total VMEM < 1 MiB).
# =============================================================================
def _patchify(x_nchw, wh_order):
    """(B,C,H,W) -> (B*h1*w1, C*P*P); rows ordered (w,h) if wh_order else (h,w)."""
    B, C, H, W = x_nchw.shape
    h1, w1 = H // PATCH, W // PATCH
    p = x_nchw.reshape(B, C, h1, PATCH, w1, PATCH)
    if wh_order:
        p = jnp.transpose(p, (0, 4, 2, 1, 3, 5))   # (B, w1, h1, C, P, P)
    else:
        p = jnp.transpose(p, (0, 2, 4, 1, 3, 5))   # (B, h1, w1, C, P, P)
    return p.reshape(B * h1 * w1, C * PATCH * PATCH)


def sm_net_forward(params, x1, x2, norm_feature=True):
    B = x1.shape[0]
    # x1 rows (w,h)-ordered (einsum output 'bwhxy'); x2 rows (h,w)-ordered.
    p_all = jnp.concatenate([_patchify(x1, True), _patchify(x2, False)],
                            axis=0).astype(jnp.bfloat16)
    xcat = jnp.concatenate([x1, x2], axis=1).reshape(B, -1).astype(jnp.bfloat16)

    kernel = functools.partial(_fused_kernel, norm_feature=norm_feature, batch=B)
    vmem = pltpu.MemorySpace.VMEM
    out = pl.pallas_call(
        kernel,
        out_shape=jax.ShapeDtypeStruct((B, OUT_W), jnp.float32),
        in_specs=[pl.BlockSpec(memory_space=vmem) for _ in range(8)],
        out_specs=pl.BlockSpec(memory_space=vmem),
    )(p_all, xcat,
      params["bb_w"], params["bb_b"],
      params["tr_w_t"], params["tr_b"],
      params["fm_w_2d"], params["fm_b"])

    transform_pred = out[:, :N_TRANSFORM_PARAMS]
    match_prob = out[:, N_TRANSFORM_PARAMS:N_TRANSFORM_PARAMS + 1]
    return match_prob, transform_pred


# =============================================================================
# Params (synthetic stand-ins) and pure-JAX reference for correctness check.
# =============================================================================
def init_params(key):
    k1, k2, k3, k4, k5, k6 = jax.random.split(key, 6)
    patch_dim = N_OF_CH * PATCH * PATCH                       # 64
    flat_img = 2 * N_OF_CH * IMAGE_SIZE * IMAGE_SIZE          # 2048
    bb_w = jax.random.normal(k1, (patch_dim, FEAT_CH), jnp.float32) * 0.1
    tr_w = jax.random.normal(k3, (flat_img, N_TRANSFORM_PARAMS), jnp.float32) * 0.02
    fm_w = jax.random.normal(k5, (HW * HW, 1), jnp.float32) * 0.05
    return {
        # bf16 MXU/VPU operands (halves the HBM->VMEM weight traffic);
        # transform weight stored transposed and UN-padded: (8, 2048).
        "bb_w": bb_w.astype(jnp.bfloat16),
        "tr_w_t": jnp.transpose(tr_w).astype(jnp.bfloat16),
        # f32 biases / matcher weights (elementwise math stays f32).
        "bb_b": jax.random.normal(k2, (1, FEAT_CH), jnp.float32) * 0.01,
        "tr_b": jax.random.normal(k4, (1, N_TRANSFORM_PARAMS), jnp.float32) * 0.01,
        "fm_w_2d": fm_w.reshape(HW, HW),
        "fm_b": jax.random.normal(k6, (1, 1), jnp.float32) * 0.01,
    }


def sm_net_forward_ref(params, x1, x2, norm_feature=True):
    """Pure-JAX reference following the PyTorch forward (NCHW einsum + view),
    with bf16 rounding applied at the same points the kernel feeds the MXU."""
    eps = 1e-6
    B, C, H, W = x1.shape
    h1, w1 = H // PATCH, W // PATCH
    bb_w = params["bb_w"].astype(jnp.float32)

    def backbone_nchw(x):
        p = x.reshape(B, C, h1, PATCH, w1, PATCH)
        p = jnp.transpose(p, (0, 2, 4, 1, 3, 5)).reshape(B * h1 * w1, -1)
        p = p.astype(jnp.bfloat16).astype(jnp.float32)        # kernel input is bf16
        f = jnp.maximum(p @ bb_w + params["bb_b"], 0.0)
        f = f.reshape(B, h1, w1, FEAT_CH)
        return jnp.transpose(f, (0, 3, 1, 2))                 # (B, F, h1, w1)

    s2 = backbone_nchw(x1)
    t2 = backbone_nchw(x2)
    if norm_feature:
        s2 = s2 / (jnp.sqrt(jnp.sum(s2 * s2, axis=1, keepdims=True)) + eps)
        t2 = t2 / (jnp.sqrt(jnp.sum(t2 * t2, axis=1, keepdims=True)) + eps)
    # kernel feeds the correlation MXU dot with bf16 features
    s2 = s2.astype(jnp.bfloat16).astype(jnp.float32)
    t2 = t2.astype(jnp.bfloat16).astype(jnp.float32)

    xcat = jnp.concatenate([x1, x2], axis=1).reshape(B, -1)
    xcat = xcat.astype(jnp.bfloat16).astype(jnp.float32)      # kernel input is bf16
    tr_w = jnp.transpose(params["tr_w_t"].astype(jnp.float32))  # (2048, 8)
    transform_pred = xcat @ tr_w + params["tr_b"]

    corr = jnp.einsum("bfhw,bfxy->bwhxy", s2, t2)
    corr = corr.reshape(B, h1 * w1, h1, w1)
    if norm_feature:
        corr = jnp.maximum(corr, 0.0)
        corr = corr / (jnp.sqrt(jnp.sum(corr * corr, axis=1, keepdims=True)) + eps)

    logit = jnp.sum(corr.reshape(B, -1) * params["fm_w_2d"].reshape(1, -1),
                    axis=-1, keepdims=True) + params["fm_b"]
    return jax.nn.sigmoid(logit), transform_pred


if __name__ == "__main__":
    key = jax.random.PRNGKey(0)
    kx1, kx2, kp = jax.random.split(key, 3)

    x1 = jax.random.normal(kx1, (BATCH_SIZE, N_OF_CH, IMAGE_SIZE, IMAGE_SIZE),
                           jnp.float32)
    x2 = jax.random.normal(kx2, (BATCH_SIZE, N_OF_CH, IMAGE_SIZE, IMAGE_SIZE),
                           jnp.float32)
    params = init_params(kp)

    fwd = jax.jit(sm_net_forward)
    match_prob, transform_pred = fwd(params, x1, x2)
    jax.block_until_ready((match_prob, transform_pred))

    assert match_prob.shape == (BATCH_SIZE, 1)
    assert transform_pred.shape == (BATCH_SIZE, N_TRANSFORM_PARAMS)
    assert bool(jnp.all(jnp.isfinite(match_prob)))
    assert bool(jnp.all(jnp.isfinite(transform_pred)))

    # correctness vs pure-JAX reference (validates the (w,h)/(h,w) flatten,
    # the dim=1 correlation norm, the matcher flatten and the output packing;
    # both paths use the same bf16 operand rounding so tolerances are tight)
    mp_ref, tp_ref = sm_net_forward_ref(params, x1, x2)
    assert bool(jnp.allclose(transform_pred, tp_ref, rtol=1e-3, atol=1e-3))
    assert bool(jnp.allclose(match_prob, mp_ref, rtol=1e-3, atol=1e-3))

    print("KERNEL_OK")
</pallas_src>

<mosaic_0001>
module attributes {stable_mosaic.version = 11 : i64} {
  func.func @_fused_kernel(%arg0: memref<64x64xbf16, #tpu.memory_space<vmem>>, %arg1: memref<2x2048xbf16, #tpu.memory_space<vmem>>, %arg2: memref<64x32xbf16, #tpu.memory_space<vmem>>, %arg3: memref<1x32xf32, #tpu.memory_space<vmem>>, %arg4: memref<8x2048xbf16, #tpu.memory_space<vmem>>, %arg5: memref<1x8xf32, #tpu.memory_space<vmem>>, %arg6: memref<16x16xf32, #tpu.memory_space<vmem>>, %arg7: memref<1x1xf32, #tpu.memory_space<vmem>>, %arg8: memref<2x128xf32, #tpu.memory_space<vmem>>) attributes {dimension_semantics = [], scalar_prefetch = 0 : i64, scratch_operands = 0 : i64, tpu.core_type = #tpu.core_type<tc>} {
    %c0 = arith.constant 0 : index
    %c0_0 = arith.constant 0 : index
    %0 = vector.load %arg0[%c0, %c0_0] : memref<64x64xbf16, #tpu.memory_space<vmem>>, vector<64x64xbf16>
    %c0_1 = arith.constant 0 : index
    %c0_2 = arith.constant 0 : index
    %1 = vector.load %arg2[%c0_1, %c0_2] : memref<64x32xbf16, #tpu.memory_space<vmem>>, vector<64x32xbf16>
    %cst = arith.constant dense<0.000000e+00> : vector<64x32xf32>
    %2 = tpu.matmul %0, %1, %cst {dimension_numbers = #tpu.dot_dimension_numbers<[1], [0], [0], [1], [0, 0, 1, 1], [], []>} : vector<64x64xbf16>, vector<64x32xbf16>, vector<64x32xf32> -> vector<64x32xf32>
    %c0_3 = arith.constant 0 : index
    %c0_4 = arith.constant 0 : index
    %3 = vector.load %arg3[%c0_3, %c0_4] : memref<1x32xf32, #tpu.memory_space<vmem>>, vector<1x32xf32>
    %4 = vector.broadcast %3 : vector<1x32xf32> to vector<64x32xf32>
    %5 = arith.addf %2, %4 : vector<64x32xf32>
    %cst_5 = arith.constant 0.000000e+00 : f32
    %6 = vector.broadcast %cst_5 : f32 to vector<64x32xf32>
    %7 = arith.maximumf %5, %6 : vector<64x32xf32>
    %8 = arith.mulf %7, %7 : vector<64x32xf32>
    %cst_6 = arith.constant dense<0.000000e+00> : vector<64xf32>
    %9 = vector.multi_reduction <add>, %8, %cst_6 [1] : vector<64x32xf32> to vector<64xf32>
    %10 = vector.shape_cast %9 : vector<64xf32> to vector<64x1xf32>
    %11 = math.sqrt %10 : vector<64x1xf32>
    %cst_7 = arith.constant 9.99999997E-7 : f32
    %12 = vector.broadcast %cst_7 : f32 to vector<64x1xf32>
    %13 = arith.addf %11, %12 : vector<64x1xf32>
    %14 = vector.broadcast %13 : vector<64x1xf32> to vector<64x32xf32>
    %15 = arith.divf %7, %14 : vector<64x32xf32>
    %16 = arith.truncf %15 : vector<64x32xf32> to vector<64x32xbf16>
    %c0_8 = arith.constant 0 : index
    %c0_9 = arith.constant 0 : index
    %17 = vector.load %arg6[%c0_8, %c0_9] : memref<16x16xf32, #tpu.memory_space<vmem>>, vector<16x16xf32>
    %c0_10 = arith.constant 0 : index
    %c0_11 = arith.constant 0 : index
    %18 = vector.load %arg4[%c0_10, %c0_11] : memref<8x2048xbf16, #tpu.memory_space<vmem>>, vector<8x2048xbf16>
    %19 = arith.extf %18 : vector<8x2048xbf16> to vector<8x2048xf32>
    %20 = tpu.iota {dimensions = array<i32: 0>} : vector<8x8xi32>
    %21 = tpu.iota {dimensions = array<i32: 1>} : vector<8x8xi32>
    %22 = arith.cmpi eq, %20, %21 : vector<8x8xi32>
    %23 = arith.extui %22 : vector<8x8xi1> to vector<8x8xi32>
    %24 = arith.sitofp %23 : vector<8x8xi32> to vector<8x8xf32>
    %cst_12 = arith.constant 0.000000e+00 : f32
    %25 = vector.broadcast %cst_12 : f32 to vector<2x128xf32>
    %c0_13 = arith.constant 0 : index
    %c0_14 = arith.constant 0 : index
    %26 = vector.load %arg8[%c0_13, %c0_14] : memref<2x128xf32, #tpu.memory_space<vmem>>, vector<2x128xf32>
    tpu.vector_store %arg8[%c0_13, %c0_14], %25 {strides = array<i32>} : memref<2x128xf32, #tpu.memory_space<vmem>>, vector<2x128xf32>,
    %27 = vector.extract_strided_slice %16 {offsets = [0, 0], sizes = [16, 32], strides = [1, 1]} : vector<64x32xbf16> to vector<16x32xbf16>
    %28 = vector.extract_strided_slice %16 {offsets = [32, 0], sizes = [16, 32], strides = [1, 1]} : vector<64x32xbf16> to vector<16x32xbf16>
    "tpu.trace_start"() <{level = 10 : i32, message = "rf,cf->rc"}> : () -> ()
    %cst_15 = arith.constant dense<0.000000e+00> : vector<16x16xf32>
    %29 = tpu.matmul %27, %28, %cst_15 {dimension_numbers = #tpu.dot_dimension_numbers<[1], [1], [0], [0], [0, 0, 1, 0], [], []>} : vector<16x32xbf16>, vector<16x32xbf16>, vector<16x16xf32> -> vector<16x16xf32>
    "tpu.trace_stop"() : () -> ()
    %cst_16 = arith.constant 0.000000e+00 : f32
    %30 = vector.broadcast %cst_16 : f32 to vector<16x16xf32>
    %31 = arith.maximumf %29, %30 : vector<16x16xf32>
    %32 = arith.mulf %31, %31 : vector<16x16xf32>
    %cst_17 = arith.constant dense<0.000000e+00> : vector<16xf32>
    %33 = vector.multi_reduction <add>, %32, %cst_17 [0] : vector<16x16xf32> to vector<16xf32>
    %34 = vector.shape_cast %33 : vector<16xf32> to vector<1x16xf32>
    %35 = math.sqrt %34 : vector<1x16xf32>
    %cst_18 = arith.constant 9.99999997E-7 : f32
    %36 = vector.broadcast %cst_18 : f32 to vector<1x16xf32>
    %37 = arith.addf %35, %36 : vector<1x16xf32>
    %38 = vector.broadcast %37 : vector<1x16xf32> to vector<16x16xf32>
    %39 = arith.divf %31, %38 : vector<16x16xf32>
    %40 = arith.mulf %39, %17 : vector<16x16xf32>
    %cst_19 = arith.constant dense<0.000000e+00> : vector<16xf32>
    %41 = vector.multi_reduction <add>, %40, %cst_19 [1] : vector<16x16xf32> to vector<16xf32>
    %42 = vector.shape_cast %41 : vector<16xf32> to vector<16x1xf32>
    %cst_20 = arith.constant dense<0.000000e+00> : vector<1xf32>
    %43 = vector.multi_reduction <add>, %42, %cst_20 [0] : vector<16x1xf32> to vector<1xf32>
    %44 = vector.shape_cast %43 : vector<1xf32> to vector<1x1xf32>
    %c0_21 = arith.constant 0 : index
    %c0_22 = arith.constant 0 : index
    %45 = vector.load %arg7[%c0_21, %c0_22] : memref<1x1xf32, #tpu.memory_space<vmem>>, vector<1x1xf32>
    %46 = arith.addf %44, %45 : vector<1x1xf32>
    %47 = arith.negf %46 : vector<1x1xf32>
    %48 = math.exp %47 : vector<1x1xf32>
    %cst_23 = arith.constant 1.000000e+00 : f32
    %49 = vector.broadcast %cst_23 : f32 to vector<1x1xf32>
    %50 = arith.addf %49, %48 : vector<1x1xf32>
    %51 = arith.divf %49, %50 : vector<1x1xf32>
    %c0_24 = arith.constant 0 : index
    %c8 = arith.constant 8 : index
    %52 = vector.load %arg8[%c0_24, %c8] : memref<2x128xf32, #tpu.memory_space<vmem>>, vector<1x1xf32>
    tpu.vector_store %arg8[%c0_24, %c8], %51 {strides = array<i32>} : memref<2x128xf32, #tpu.memory_space<vmem>>, vector<1x1xf32>,
    %c0_25 = arith.constant 0 : index
    %c0_26 = arith.constant 0 : index
    %53 = vector.load %arg1[%c0_25, %c0_26] : memref<2x2048xbf16, #tpu.memory_space<vmem>>, vector<1x2048xbf16>
    %54 = arith.extf %53 : vector<1x2048xbf16> to vector<1x2048xf32>
    %55 = vector.broadcast %54 : vector<1x2048xf32> to vector<8x2048xf32>
    %56 = arith.mulf %19, %55 : vector<8x2048xf32>
    %cst_27 = arith.constant dense<0.000000e+00> : vector<8xf32>
    %57 = vector.multi_reduction <add>, %56, %cst_27 [1] : vector<8x2048xf32> to vector<8xf32>
    %58 = vector.shape_cast %57 : vector<8xf32> to vector<8x1xf32>
    %59 = vector.broadcast %58 : vector<8x1xf32> to vector<8x8xf32>
    %60 = arith.mulf %59, %24 : vector<8x8xf32>
    %cst_28 = arith.constant dense<0.000000e+00> : vector<8xf32>
    %61 = vector.multi_reduction <add>, %60, %cst_28 [0] : vector<8x8xf32> to vector<8xf32>
    %62 = vector.shape_cast %61 : vector<8xf32> to vector<1x8xf32>
    %c0_29 = arith.constant 0 : index
    %c0_30 = arith.constant 0 : index
    %63 = vector.load %arg5[%c0_29, %c0_30] : memref<1x8xf32, #tpu.memory_space<vmem>>, vector<1x8xf32>
    %64 = arith.addf %62, %63 : vector<1x8xf32>
    %c0_31 = arith.constant 0 : index
    %c0_32 = arith.constant 0 : index
    %65 = vector.load %arg8[%c0_31, %c0_32] : memref<2x128xf32, #tpu.memory_space<vmem>>, vector<1x8xf32>
    tpu.vector_store %arg8[%c0_31, %c0_32], %64 {strides = array<i32>} : memref<2x128xf32, #tpu.memory_space<vmem>>, vector<1x8xf32>,
    %66 = vector.extract_strided_slice %16 {offsets = [16, 0], sizes = [16, 32], strides = [1, 1]} : vector<64x32xbf16> to vector<16x32xbf16>
    %67 = vector.extract_strided_slice %16 {offsets = [48, 0], sizes = [16, 32], strides = [1, 1]} : vector<64x32xbf16> to vector<16x32xbf16>
    "tpu.trace_start"() <{level = 10 : i32, message = "rf,cf->rc"}> : () -> ()
    %cst_33 = arith.constant dense<0.000000e+00> : vector<16x16xf32>
    %68 = tpu.matmul %66, %67, %cst_33 {dimension_numbers = #tpu.dot_dimension_numbers<[1], [1], [0], [0], [0, 0, 1, 0], [], []>} : vector<16x32xbf16>, vector<16x32xbf16>, vector<16x16xf32> -> vector<16x16xf32>
    "tpu.trace_stop"() : () -> ()
    %cst_34 = arith.constant 0.000000e+00 : f32
    %69 = vector.broadcast %cst_34 : f32 to vector<16x16xf32>
    %70 = arith.maximumf %68, %69 : vector<16x16xf32>
    %71 = arith.mulf %70, %70 : vector<16x16xf32>
    %cst_35 = arith.constant dense<0.000000e+00> : vector<16xf32>
    %72 = vector.multi_reduction <add>, %71, %cst_35 [0] : vector<16x16xf32> to vector<16xf32>
    %73 = vector.shape_cast %72 : vector<16xf32> to vector<1x16xf32>
    %74 = math.sqrt %73 : vector<1x16xf32>
    %cst_36 = arith.constant 9.99999997E-7 : f32
    %75 = vector.broadcast %cst_36 : f32 to vector<1x16xf32>
    %76 = arith.addf %74, %75 : vector<1x16xf32>
    %77 = vector.broadcast %76 : vector<1x16xf32> to vector<16x16xf32>
    %78 = arith.divf %70, %77 : vector<16x16xf32>
    %79 = arith.mulf %78, %17 : vector<16x16xf32>
    %cst_37 = arith.constant dense<0.000000e+00> : vector<16xf32>
    %80 = vector.multi_reduction <add>, %79, %cst_37 [1] : vector<16x16xf32> to vector<16xf32>
    %81 = vector.shape_cast %80 : vector<16xf32> to vector<16x1xf32>
    %cst_38 = arith.constant dense<0.000000e+00> : vector<1xf32>
    %82 = vector.multi_reduction <add>, %81, %cst_38 [0] : vector<16x1xf32> to vector<1xf32>
    %83 = vector.shape_cast %82 : vector<1xf32> to vector<1x1xf32>
    %c0_39 = arith.constant 0 : index
    %c0_40 = arith.constant 0 : index
    %84 = vector.load %arg7[%c0_39, %c0_40] : memref<1x1xf32, #tpu.memory_space<vmem>>, vector<1x1xf32>
    %85 = arith.addf %83, %84 : vector<1x1xf32>
    %86 = arith.negf %85 : vector<1x1xf32>
    %87 = math.exp %86 : vector<1x1xf32>
    %cst_41 = arith.constant 1.000000e+00 : f32
    %88 = vector.broadcast %cst_41 : f32 to vector<1x1xf32>
    %89 = arith.addf %88, %87 : vector<1x1xf32>
    %90 = arith.divf %88, %89 : vector<1x1xf32>
    %c1 = arith.constant 1 : index
    %c8_42 = arith.constant 8 : index
    %91 = vector.load %arg8[%c1, %c8_42] : memref<2x128xf32, #tpu.memory_space<vmem>>, vector<1x1xf32>
    tpu.vector_store %arg8[%c1, %c8_42], %90 {strides = array<i32>} : memref<2x128xf32, #tpu.memory_space<vmem>>, vector<1x1xf32>,
    %c1_43 = arith.constant 1 : index
    %c0_44 = arith.constant 0 : index
    %92 = vector.load %arg1[%c1_43, %c0_44] : memref<2x2048xbf16, #tpu.memory_space<vmem>>, vector<1x2048xbf16>
    %93 = arith.extf %92 : vector<1x2048xbf16> to vector<1x2048xf32>
    %94 = vector.broadcast %93 : vector<1x2048xf32> to vector<8x2048xf32>
    %95 = arith.mulf %19, %94 : vector<8x2048xf32>
    %cst_45 = arith.constant dense<0.000000e+00> : vector<8xf32>
    %96 = vector.multi_reduction <add>, %95, %cst_45 [1] : vector<8x2048xf32> to vector<8xf32>
    %97 = vector.shape_cast %96 : vector<8xf32> to vector<8x1xf32>
    %98 = vector.broadcast %97 : vector<8x1xf32> to vector<8x8xf32>
    %99 = arith.mulf %98, %24 : vector<8x8xf32>
    %cst_46 = arith.constant dense<0.000000e+00> : vector<8xf32>
    %100 = vector.multi_reduction <add>, %99, %cst_46 [0] : vector<8x8xf32> to vector<8xf32>
    %101 = vector.shape_cast %100 : vector<8xf32> to vector<1x8xf32>
    %c0_47 = arith.constant 0 : index
    %c0_48 = arith.constant 0 : index
    %102 = vector.load %arg5[%c0_47, %c0_48] : memref<1x8xf32, #tpu.memory_space<vmem>>, vector<1x8xf32>
    %103 = arith.addf %101, %102 : vector<1x8xf32>
    %c1_49 = arith.constant 1 : index
    %c0_50 = arith.constant 0 : index
    %104 = vector.load %arg8[%c1_49, %c0_50] : memref<2x128xf32, #tpu.memory_space<vmem>>, vector<1x8xf32>
    tpu.vector_store %arg8[%c1_49, %c0_50], %103 {strides = array<i32>} : memref<2x128xf32, #tpu.memory_space<vmem>>, vector<1x8xf32>,
    return
  }
}

</mosaic_0001>

<bundles_post_ra>
// kernel: sm_net_forward.1
= control target key start
LH: loop header
LB: loop body
LE: loop exit
PB: predicated region body
PF: predicated region fallthrough
CT: control target
= control target key end

     0   :  { %vm99_vm0 = vcmask 523264   ;;  %vm193_vm1 = vcmask 261120   ;;  %v1063_v49 = vmov 0.0   ;;  %vm1064_vm2 = vmmov 0   ;;  %s1065_s21 = smov 8   ;;  %s1530_s2 = inlined_call_operand.vmem [shape: bf16[64,32], index: 2, kind: input, shape index: {}]   ;;  %s1531_s0 = inlined_call_operand.vmem [shape: bf16[64,64], index: 0, kind: input, shape index: {}]   ;;  %s1532_s3 = inlined_call_operand.vmem [shape: f32[1,32], index: 3, kind: input, shape index: {}]   ;;  %s1533_s1 = inlined_call_operand.vmem [shape: bf16[2,2048], index: 1, kind: input, shape index: {}]   ;;  %s1534_s4 = inlined_call_operand.vmem [shape: bf16[8,2048], index: 4, kind: input, shape index: {}]   ;;  %s1535_s6 = inlined_call_operand.vmem [shape: f32[16,16], index: 6, kind: input, shape index: {}]   ;;  %s1536_s7 = inlined_call_operand.<no memory space> [shape: f32[1,1], index: 7, kind: input, shape index: {}]   ;;  %s1537_s8 = inlined_call_operand.vmem [shape: f32[2,128], index: 8, kind: output, shape index: {}]   ;;  %s1538_s5 = inlined_call_operand.vmem [shape: f32[1,8], index: 5, kind: input, shape index: {}]  }
   0x1   :  { %v1007_v0 = vld [vmem:[%s1530_s2 + $0x18] sm:$0xff]   ;;  %v1008_v1 = vld [vmem:[%s1530_s2 + $0x10] sm:$0xff]   ;;  %v1009_v2 = vld [vmem:[%s1530_s2 + $0x8] sm:$0xff]   ;;  %992 = vmatprep.subr.bf16.mxu1 %v1063_v49  ;;  %994 = vmatprep.mubr.msk.bf16.mxu1 %vm1064_vm2, %v1063_v49  ;;  %335 = vst [vmem:[%s1537_s8] sm:$0x3] %v1063_v49 }
   0x2   :  { %976 = vmatprep.subr.bf16.mxu0 %v1007_v0  ;;  %v1011_v3 = vld [vmem:[%s1531_s0] sm:$0xff]   ;;  %v1012_v5 = vld [vmem:[%s1531_s0 + $0x8] sm:$0xff]   ;;  %v1013_v6 = vld [vmem:[%s1531_s0 + $0x10] sm:$0xff]  }
   0x3   :  { %977 = vmatpush3.bf16.msra.mxu0 %v1007_v0  ;;  %984 = vmatprep.mubr.msk.bf16.mxu0 %vm99_vm0, %v1011_v3  ;;  %v1010_v4 = vld [vmem:[%s1530_s2] sm:$0xff]   ;;  %v1014_v7 = vld [vmem:[%s1531_s0 + $0x18] sm:$0xff]  }
   0x4   :  { %978 = vmatprep.subr.bf16.mxu0 %v1008_v1  ;;  %v946_v9 = vld [vmem:[%s1532_s3] ss:$0 sm:$0xff] }
   0x7   :  { %979 = vmatpush3.bf16.msra.mxu0 %v1008_v1 }
   0x8   :  { %980 = vmatprep.subr.bf16.mxu0 %v1009_v2 }
   0xb   :  { %981 = vmatpush3.bf16.msra.mxu0 %v1009_v2 }
   0xc   :  { %982 = vmatprep.subr.bf16.mxu0 %v1010_v4 }
   0xf   :  { %983 = vmatpush3.bf16.msra.mxu0 %v1010_v4 }
  0x12   :  { %985 = vmatmul.mubr.msk.bf16.vlgmr.msra.gmra.mxu0 %vm99_vm0, %v1012_v5 }
  0x13   :  { %988 = vmatprep.mubr.msk.bf16.mxu0 %vm99_vm0, %v1013_v6 }
  0x1a   :  { %989 = vmatmul.mubr.msk.bf16.gmra.mxu0 %vm99_vm0, %v1014_v7 }
  0xd2   :  { %v986_v8 = vpop.f32.mrf.mxu0 }
  0xd3   :  { %v155_v34 = vadd.f32 %v986_v8, %v946_v9 }
  0xd4   :  { %v146_v10 = vpop.f32.mrf.mxu0 }
  0xd5   :  { %v147_v11 = vadd.f32 %v946_v9, %v146_v10  ;;  %v1168_v42 = vmax.f32 %v155_v34, 0.0 }
  0xd6   :  { %v987_v12 = vpop.f32.mrf.mxu0 }
  0xd7   :  { %v1138_v13 = vmax.f32 %v147_v11, 0.0  ;;  %v158_v21 = vadd.f32 %v987_v12, %v946_v9  ;;  %v187_v47 = vmul.f32 %v1168_v42, %v1168_v42 }
  0xd8   :  { %v149_v14 = vpop.f32.mrf.mxu0 }
  0xd9   :  { %v150_v15 = vadd.f32 %v946_v9, %v149_v14  ;;  %v185_v16 = vmul.f32 %v1138_v13, %v1138_v13  ;;  %v1150_v30 = vmax.f32 %v158_v21, 0.0  ;;  %v200_v48 = vsel %vm193_vm1, %v187_v47, 0.0 }
  0xda   :  { %v990_v17 = vpop.f32.mrf.mxu0 }
  0xdb   :  { %v1142_v18 = vmax.f32 %v150_v15, 0.0  ;;  %v194_v19 = vsel %vm193_vm1, %v185_v16, 0.0  ;;  %v171_v25 = vadd.f32 %v990_v17, %v946_v9  ;;  %v188_v41 = vmul.f32 %v1150_v30, %v1150_v30 }
  0xdc   :  { %v162_v20 = vpop.f32.mrf.mxu0  ;;  %195 = vadd.xlane.f32.xlu1 %v194_v19 }
  0xdd   :  { %v163_v22 = vadd.f32 %v946_v9, %v162_v20  ;;  %v186_v23 = vmul.f32 %v1142_v18, %v1142_v18  ;;  %v1156_v35 = vmax.f32 %v171_v25, 0.0  ;;  %v203_v45 = vsel %vm193_vm1, %v188_v41, 0.0 }
  0xde   :  { %v991_v24 = vpop.f32.mrf.mxu0 }
  0xdf   :  { %v1147_v26 = vmax.f32 %v163_v22, 0.0  ;;  %v174_v27 = vadd.f32 %v991_v24, %v946_v9  ;;  %v197_v28 = vsel %vm193_vm1, %v186_v23, 0.0  ;;  %v191_v44 = vmul.f32 %v1156_v35, %v1156_v35 }
  0xe0   :  { %v165_v29 = vpop.f32.mrf.mxu0  ;;  %198 = vadd.xlane.f32.xlu1 %v197_v28 }
  0xe1   :  { %v1152_v31 = vmax.f32 %v174_v27, 0.0  ;;  %v166_v32 = vadd.f32 %v946_v9, %v165_v29  ;;  %v189_v33 = vmul.f32 %v1147_v26, %v1147_v26  ;;  %v212_v46 = vsel %vm193_vm1, %v191_v44, 0.0 }
  0xe3   :  { %v1158_v36 = vmax.f32 %v166_v32, 0.0  ;;  %v206_v37 = vsel %vm193_vm1, %v189_v33, 0.0  ;;  %v192_v38 = vmul.f32 %v1152_v31, %v1152_v31 }
  0xe4   :  { %207 = vadd.xlane.f32.xlu0 %v206_v37 }
  0xe5   :  { %v215_v39 = vsel %vm193_vm1, %v192_v38, 0.0  ;;  %v190_v40 = vmul.f32 %v1158_v36, %v1158_v36 }
  0xe6   :  { %216 = vadd.xlane.f32.xlu1 %v215_v39 }
  0xe7   :  { %v209_v43 = vsel %vm193_vm1, %v190_v40, 0.0 }
  0xe8   :  { %210 = vadd.xlane.f32.xlu0 %v209_v43 }
  0xea   :  { %204 = vadd.xlane.f32.xlu1 %v203_v45 }
  0xec   :  { %213 = vadd.xlane.f32.xlu0 %v212_v46 }
  0xf0   :  { %201 = vadd.xlane.f32.xlu0 %v200_v48 }
 0x165   :  { %v196_v50 = vpop.xlane.xlu1 %195 }
 0x166   :  { %vm220_vm3 = vcmp.eq.f32.partialorder %v196_v50, inf  ;;  %vm222_vm12 = vcmp.eq.f32.partialorder %v196_v50, 0.0  ;;  %v223_v21 = vand.u32 2147483648, %v196_v50 }
 0x169   :  { %v199_v51 = vpop.xlane.xlu1 %198 }
 0x16a   :  { %1015 = vrsqrt.f32 %v199_v51  ;;  %vm227_vm4 = vcmp.eq.f32.partialorder %v199_v51, inf  ;;  %vm229_vm7 = vcmp.eq.f32.partialorder %v199_v51, 0.0  ;;  %v230_v6 = vand.u32 2147483648, %v199_v51 }
 0x16b   :  { %1017 = vrsqrt.f32 %v196_v50 }
 0x16d   :  { %v208_v52 = vpop.xlane.xlu0 %207 }
 0x16e   :  { %1019 = vrsqrt.f32 %v208_v52  ;;  %vm248_vm5 = vcmp.eq.f32.partialorder %v208_v52, inf  ;;  %vm250_vm6 = vcmp.eq.f32.partialorder %v208_v52, 0.0  ;;  %v251_v0 = vand.u32 2147483648, %v208_v52 }
 0x16f   :  { %v217_v53 = vpop.xlane.xlu1 %216 }
 0x170   :  { %1021 = vrsqrt.f32 %v217_v53  ;;  %vm269_vm8 = vcmp.eq.f32.partialorder %v217_v53, inf  ;;  %v272_v10 = vand.u32 2147483648, %v217_v53  ;;  %vm271_vm9 = vcmp.eq.f32.partialorder %v217_v53, 0.0 }
 0x171   :  { %v211_v54 = vpop.xlane.xlu0 %210 }
 0x172   :  { %1023 = vrsqrt.f32 %v211_v54  ;;  %vm255_vm10 = vcmp.eq.f32.partialorder %v211_v54, inf  ;;  %v258_v14 = vand.u32 2147483648, %v211_v54  ;;  %vm257_vm11 = vcmp.eq.f32.partialorder %v211_v54, 0.0 }
 0x173   :  { %v1181_v55 = vpop.xlane.xlu1 %204 }
 0x174   :  { %1025 = vrsqrt.f32 %v1181_v55  ;;  %vm241_vm15 = vcmp.eq.f32.partialorder %v1181_v55, inf  ;;  %v244_v44 = vand.u32 2147483648, %v1181_v55 }
 0x175   :  { %v214_v56 = vpop.xlane.xlu0 %213 }
 0x176   :  { %1027 = vrsqrt.f32 %v214_v56  ;;  %vm262_vm13 = vcmp.eq.f32.partialorder %v214_v56, inf  ;;  %v265_v29 = vand.u32 2147483648, %v214_v56  ;;  %vm264_vm14 = vcmp.eq.f32.partialorder %v214_v56, 0.0 }
 0x177   :  { %v1016_v57 = vpop.eup %1015 }
 0x178   :  { %v1018_v59 = vpop.eup %1017  ;;  %v226_v60 = vmul.f32 %v1016_v57, %v199_v51 }
 0x179   :  { %v1184_v58 = vpop.xlane.xlu0 %201  ;;  %v219_v1 = vmul.f32 %v1018_v59, %v196_v50 }
 0x17a   :  { %1029 = vrsqrt.f32 %v1184_v58  ;;  %v228_v2 = vsel %vm227_vm4, %v199_v51, %v226_v60  ;;  %vm234_vm0 = vcmp.eq.f32.partialorder %v1184_v58, inf  ;;  %v237_v43 = vand.u32 2147483648, %v1184_v58 }
 0x17b   :  { %v1020_v61 = vpop.eup %1019  ;;  %v231_v12 = vsel %vm229_vm7, %v230_v6, %v228_v2  ;;  %v221_v16 = vsel %vm220_vm3, %v196_v50, %v219_v1  ;;  %vm236_vm3 = vcmp.eq.f32.partialorder %v1184_v58, 0.0  ;;  %vm243_vm4 = vcmp.eq.f32.partialorder %v1181_v55, 0.0 }
 0x17c   :  { %v247_v62 = vmul.f32 %v1020_v61, %v208_v52  ;;  %v275_v23 = vadd.f32 1e-06, %v231_v12  ;;  %v224_v27 = vsel %vm222_vm12, %v223_v21, %v221_v16 }
 0x17d   :  { %v1022_v63 = vpop.eup %1021  ;;  %v274_v38 = vadd.f32 1e-06, %v224_v27 }
 0x17e   :  { %v249_v3 = vsel %vm248_vm5, %v208_v52, %v247_v62  ;;  %v268_v4 = vmul.f32 %v1022_v63, %v217_v53  ;;  %vm387_vm5 = vcmask 130048  }
 0x17f   :  { %v1024_v5 = vpop.eup %1023  ;;  %v252_v7 = vsel %vm250_vm6, %v251_v0, %v249_v3 }
 0x180   :  { %v278_v8 = vadd.f32 1e-06, %v252_v7  ;;  %v270_v9 = vsel %vm269_vm8, %v217_v53, %v268_v4  ;;  %v254_v11 = vmul.f32 %v1024_v5, %v211_v54 }
 0x181   :  { %v1026_v15 = vpop.eup %1025  ;;  %v273_v17 = vsel %vm271_vm9, %v272_v10, %v270_v9  ;;  %vm629_vm9 = vcmask 64512  }
 0x182   :  { %v256_v19 = vsel %vm255_vm10, %v211_v54, %v254_v11  ;;  %1031 = vrcp.f32 %v278_v8  ;;  %v281_v28 = vadd.f32 1e-06, %v273_v17  ;;  %v240_v32 = vmul.f32 %v1026_v15, %v1181_v55 }
 0x183   :  { %v1028_v20 = vpop.eup %1027  ;;  %v259_v22 = vsel %vm257_vm11, %v258_v14, %v256_v19  ;;  %vm439_vm10 = vcmask 65600   ;;  %vm639_vm11 = vcmask 57344  }
 0x184   :  { %v279_v24 = vadd.f32 1e-06, %v259_v22  ;;  %v261_v25 = vmul.f32 %v1028_v20, %v214_v56  ;;  %v242_v41 = vsel %vm241_vm15, %v1181_v55, %v240_v32 }
 0x185   :  { %v245_v47 = vsel %vm243_vm4, %v244_v44, %v242_v41 }
 0x186   :  { %1033 = vrcp.f32 %v279_v24  ;;  %v263_v33 = vsel %vm262_vm13, %v214_v56, %v261_v25  ;;  %v277_v50 = vadd.f32 1e-06, %v245_v47 }
 0x187   :  { %v266_v34 = vsel %vm264_vm14, %v265_v29, %v263_v33  ;;  %v1030_v37 = vpop.eup %1029  ;;  %1035 = vrcp.f32 %v275_v23 }
 0x188   :  { %v280_v39 = vadd.f32 1e-06, %v266_v34  ;;  %1037 = vrcp.f32 %v281_v28  ;;  %v233_v40 = vmul.f32 %v1030_v37, %v1184_v58 }
 0x18a   :  { %1039 = vrcp.f32 %v280_v39  ;;  %v235_v45 = vsel %vm234_vm0, %v1184_v58, %v233_v40 }
 0x18b   :  { %1041 = vrcp.f32 %v274_v38  ;;  %v238_v46 = vsel %vm236_vm3, %v237_v43, %v235_v45 }
 0x18c   :  { %v276_v48 = vadd.f32 1e-06, %v238_v46 }
 0x18e   :  { %1043 = vrcp.f32 %v276_v48 }
 0x18f   :  { %v1032_v51 = vpop.eup %1031  ;;  %1045 = vrcp.f32 %v277_v50  ;;  %v328_v50 = vlaneseq }
 0x190   :  { %v291_v53 = vmul.f32 %v1032_v51, %v1147_v26 }
 0x193   :  { %v1034_v52 = vpop.eup %1033 }
 0x194   :  { %v293_v54 = vmul.f32 %v1034_v52, %v1158_v36  ;;  %v1036_v56 = vpop.eup %1035 }
 0x195   :  { %v1038_v57 = vpop.eup %1037  ;;  %v285_v62 = vmul.f32 %v1036_v56, %v1142_v18  ;;  %v441_v56 = vld [vmem:[%s1533_s1] sm:$0xff] }
 0x196   :  { %v300_v59 = vpack.c.bf16 %v293_v54, %v291_v53  ;;  %v297_v63 = vmul.f32 %v1038_v57, %v1152_v31  ;;  %v1234_v53 = vshrl.u32 %v328_v50, 7 }
 0x197   :  { %v1040_v60 = vpop.eup %1039 }
 0x198   :  { %v340_v58 = vsel %vm193_vm1, %v300_v59, 0  ;;  %v295_v55 = vmul.f32 %v1040_v60, %v1156_v35  ;;  %v1042_v61 = vpop.eup %1041  ;;  %v1239_v59 = vunpack.c.l.bf16 %v441_v56  ;;  %v1242_v60 = vsub.s32 1, %v1234_v53 }
 0x199   :  { %993 = vmatpush3.bf16.xpose.msra.mxu1 %v340_v58  ;;  %v283_v26 = vmul.f32 %v1042_v61, %v1138_v13 }
 0x19a   :  { %998 = vmatprep.subr.bf16.mxu1 %v1063_v49  ;;  %v301_v0 = vpack.c.bf16 %v297_v63, %v295_v55  ;;  %v1245_v55 = vsub.s32 3, %v1234_v53  ;;  %v1250_v63 = vsub.s32 5, %v1234_v53 }
 0x19b   :  { %v298_v36 = vpack.c.bf16 %v285_v62, %v283_v26  ;;  %v1044_v1 = vpop.eup %1043  ;;  %v757_v62 = vrot.slane %v1239_v59, %v1242_v60  ;;  %v1255_v26 = vld [vmem:[%s1534_s4] sm:$0xff] }
 0x19c   :  { %v645_v2 = vsel %vm193_vm1, %v301_v0, 0  ;;  %v1046_v3 = vpop.eup %1045  ;;  %v287_v18 = vmul.f32 %v1044_v1, %v1168_v42  ;;  %v761_v0 = vrot.slane %v1239_v59, %v1245_v55  ;;  %v313_v1 = vunpack.c.h.bf16 %v1255_v26 }
 0x19d   :  { %v289_v35 = vmul.f32 %v1046_v3, %v1150_v30  ;;  %v1266_v3 = vld [vmem:[%s1534_s4 + $0x8] sm:$0xff] }
 0x19f   :  { %v299_v4 = vpack.c.bf16 %v289_v35, %v287_v18  ;;  %v1269_v18 = vsub.s32 7, %v1234_v53  ;;  %v837_v35 = vrot.slane %v757_v62, %v1242_v60 }
 0x1a0   :  { %995 = vmatmul.mubr.msk.bf16.vlgmr.msra.gmra.mxu1 %vm193_vm1, %v298_v36  ;;  %v312_v36 = vunpack.c.l.bf16 %v1255_v26 }
 0x1a1   :  { %999 = vmatpush3.bf16.xpose.msra.mxu1 %v645_v2  ;;  %1000 = vmatprep.mubr.msk.bf16.mxu1 %vm1064_vm2, %v1063_v49  ;;  %v765_v2 = vrot.slane %v1239_v59, %v1250_v63 }
 0x1a8   :  { %1001 = vmatmul.mubr.msk.bf16.vlgmr.msra.gmra.mxu1 %vm193_vm1, %v299_v4  ;;  %v841_v4 = vrot.slane %v761_v0, %v1242_v60 }
 0x260   :  { %v376_v13 = vpop.f32.mrf.mxu1 }
 0x261   :  { %v1213_v31 = vmax.f32 %v376_v13, 0.0  ;;  %v314_v13 = vunpack.c.l.bf16 %v1266_v3 }
 0x262   :  { %v996_v5 = vpop.f32.mrf.mxu1 }
 0x263   :  { %v385_v7 = vmul.f32 %v1213_v31, %v1213_v31  ;;  %v1274_v5 = vunpack.c.h.bf16 %v441_v56 }
 0x264   :  { %v379_v6 = vpop.f32.mrf.mxu1 }
 0x265   :  { %v1217_v8 = vmax.f32 %v379_v6, 0.0  ;;  %v388_v30 = vsel %vm387_vm5, %v385_v7, 0.0  ;;  %v845_v6 = vrot.slane %v765_v2, %v1242_v60  ;;  %v769_v7 = vrot.slane %v1239_v59, %v1269_v18 }
 0x266   :  { %v997_v9 = vpop.f32.mrf.mxu1 }
 0x267   :  { %v386_v42 = vmul.f32 %v1217_v8, %v1217_v8  ;;  %v898_v9 = vmul.f32 %v837_v35, %v312_v36 }
 0x268   :  { %v681_v10 = vpop.f32.mrf.mxu1 }
 0x269   :  { %v389_v11 = vsel %vm387_vm5, %v386_v42, 0.0  ;;  %v1223_v12 = vmax.f32 %v681_v10, 0.0  ;;  %v899_v42 = vmul.f32 %v841_v4, %v313_v1 }
 0x26a   :  { %v390_v14 = vadd.f32 %v389_v11, %v388_v30  ;;  %v1002_v15 = vpop.f32.mrf.mxu1  ;;  %v303_v30 = vld [vmem:[%s1535_s6 + $0x8] sm:$0xff]  ;;  %v302_v11 = vld [vmem:[%s1535_s6] sm:$0xff] }
 0x26b   :  { %v690_v19 = vmul.f32 %v1223_v12, %v1223_v12  ;;  %v773_v15 = vrot.slane %v1274_v5, %v1242_v60 }
 0x26c   :  { %v391_v16 = vrot.slane %v390_v14, 4  ;;  %v684_v17 = vpop.f32.mrf.mxu1 }
 0x26d   :  { %v1227_v20 = vmax.f32 %v684_v17, 0.0  ;;  %v692_v25 = vsel %vm387_vm5, %v690_v19, 0.0 }
 0x26e   :  { %v392_v21 = vadd.f32 %v391_v16, %v390_v14  ;;  %v1003_v22 = vpop.f32.mrf.mxu1  ;;  %v315_v14 = vunpack.c.h.bf16 %v1266_v3  ;;  %v900_v16 = vmul.f32 %v845_v6, %v314_v13 }
 0x26f   :  { %v691_v23 = vmul.f32 %v1227_v20, %v1227_v20  ;;  %v849_v22 = vrot.slane %v769_v7, %v1242_v60 }
 0x270   :  { %v393_v24 = vrot.slane %v392_v21, 2 }
 0x271   :  { %v693_v27 = vsel %vm387_vm5, %v691_v23, 0.0  ;;  %v914_v23 = vadd.f32 %v899_v42, %v898_v9 }
 0x272   :  { %v394_v28 = vadd.f32 %v393_v24, %v392_v21  ;;  %v694_v29 = vadd.f32 %v693_v27, %v692_v25  ;;  %v1299_v21 = vld [vmem:[%s1534_s4 + $0x10] sm:$0xff]  ;;  %v777_v25 = vrot.slane %v1274_v5, %v1245_v55  ;;  %v853_v27 = vrot.slane %v773_v15, %v1242_v60 }
 0x273   :  { %v316_v24 = vunpack.c.l.bf16 %v1299_v21 }
 0x274   :  { %v395_v32 = vrot.slane %v394_v28, 1  ;;  %v695_v33 = vrot.slane %v694_v29, 4 }
 0x276   :  { %v396_v34 = vadd.f32 %v395_v32, %v394_v28  ;;  %v696_v37 = vadd.f32 %v695_v33, %v694_v29  ;;  %v317_v32 = vunpack.c.h.bf16 %v1299_v21  ;;  %v781_v33 = vrot.slane %v1274_v5, %v1250_v63 }
 0x278   :  { %1047 = vrsqrt.f32 %v396_v34  ;;  %v697_v38 = vrot.slane %v696_v37, 2  ;;  %vm399_vm1 = vcmp.eq.f32.partialorder %v396_v34, inf  ;;  %v402_v45 = vand.u32 2147483648, %v396_v34 }
 0x279   :  { %vm401_vm2 = vcmp.eq.f32.partialorder %v396_v34, 0.0 }
 0x27a   :  { %v698_v39 = vadd.f32 %v697_v38, %v696_v37  ;;  %v902_v37 = vmul.f32 %v853_v27, %v316_v24 }
 0x27c   :  { %v699_v40 = vrot.slane %v698_v39, 1 }
 0x27e   :  { %v700_v41 = vadd.f32 %v699_v40, %v698_v39  ;;  %v1319_v40 = vld [vmem:[%s1534_s4 + $0x18] sm:$0xff] }
 0x280   :  { %1049 = vrsqrt.f32 %v700_v41  ;;  %vm703_vm6 = vcmp.eq.f32.partialorder %v700_v41, inf  ;;  %v706_v54 = vand.u32 2147483648, %v700_v41  ;;  %vm705_vm7 = vcmp.eq.f32.partialorder %v700_v41, 0.0 }
 0x285   :  { %v1048_v43 = vpop.eup %1047 }
 0x286   :  { %v398_v44 = vmul.f32 %v1048_v43, %v396_v34 }
 0x288   :  { %v400_v46 = vsel %vm399_vm1, %v396_v34, %v398_v44  ;;  %v857_v34 = vrot.slane %v777_v25, %v1242_v60  ;;  %v318_v44 = vunpack.c.l.bf16 %v1319_v40 }
 0x289   :  { %v403_v47 = vsel %vm401_vm2, %v402_v45, %v400_v46  ;;  %v785_v46 = vrot.slane %v1274_v5, %v1269_v18 }
 0x28a   :  { %v404_v48 = vadd.f32 1e-06, %v403_v47  ;;  %v861_v47 = vrot.slane %v781_v33, %v1242_v60 }
 0x28b   :  { %v865_v56 = vrot.slane %v785_v46, %v1242_v60  ;;  %v1396_v46 = vsub.s32 6, %v1234_v53 }
 0x28c   :  { %1051 = vrcp.f32 %v404_v48  ;;  %v903_v48 = vmul.f32 %v857_v34, %v317_v32 }
 0x28d   :  { %v1050_v51 = vpop.eup %1049 }
 0x28e   :  { %v702_v52 = vmul.f32 %v1050_v51, %v700_v41 }
 0x290   :  { %v704_v57 = vsel %vm703_vm6, %v700_v41, %v702_v52  ;;  %v745_v41 = vld [vmem:[%s1533_s1 + $0x8] sm:$0xff]  ;;  %v319_v52 = vunpack.c.h.bf16 %v1319_v40 }
 0x291   :  { %v707_v58 = vsel %vm705_vm7, %v706_v54, %v704_v57  ;;  %v1325_v45 = vunpack.c.l.bf16 %v745_v41  ;;  %v904_v57 = vmul.f32 %v861_v47, %v318_v44  ;;  %v1368_v25 = vunpack.c.h.bf16 %v745_v41 }
 0x292   :  { %v708_v61 = vadd.f32 1e-06, %v707_v58  ;;  %v905_v7 = vmul.f32 %v865_v56, %v319_v52 }
 0x293   :  { %v789_v54 = vrot.slane %v1325_v45, %v1242_v60  ;;  %v793_v4 = vrot.slane %v1325_v45, %v1245_v55  ;;  %v801_v27 = vrot.slane %v1325_v45, %v1269_v18  ;;  %v805_v34 = vrot.slane %v1368_v25, %v1242_v60 }
 0x294   :  { %1053 = vrcp.f32 %v708_v61  ;;  %v1341_v61 = vld [vmem:[%s1534_s4 + $0x20] sm:$0xff] }
 0x295   :  { %v320_v35 = vunpack.c.l.bf16 %v1341_v61  ;;  %v869_v6 = vrot.slane %v789_v54, %v1242_v60  ;;  %v321_v15 = vunpack.c.h.bf16 %v1341_v61 }
 0x299   :  { %v1052_v10 = vpop.eup %1051 }
 0x29a   :  { %v407_v17 = vmul.f32 %v1052_v10, %v1217_v8  ;;  %v406_v19 = vmul.f32 %v1052_v10, %v1213_v31  ;;  %v901_v31 = vmul.f32 %v849_v22, %v315_v14  ;;  %v915_v8 = vadd.f32 %v914_v23, %v900_v16 }
 0x29b   :  { %v1360_v16 = vsub.s32 0, %v1234_v53 }
 0x29c   :  { %v409_v28 = vmul.f32 %v407_v17, %v303_v30  ;;  %v408_v29 = vmul.f32 %v406_v19, %v302_v11  ;;  %v916_v43 = vadd.f32 %v915_v8, %v901_v31  ;;  %v873_v17 = vrot.slane %v793_v4, %v1242_v60 }
 0x29d   :  { %v906_v19 = vmul.f32 %v869_v6, %v320_v35  ;;  %v1376_v31 = vsub.s32 2, %v1234_v53  ;;  %v13_v8 = vstv %s1536_s7  ;;  %v454_v56 = vrot.slane %v1239_v59, %v1360_v16 }
 0x29e   :  { %v413_v38 = vsel %vm387_vm5, %v409_v28, 0.0  ;;  %v410_v39 = vsel %vm387_vm5, %v408_v29, 0.0  ;;  %v917_v51 = vadd.f32 %v916_v43, %v902_v37  ;;  %v907_v29 = vmul.f32 %v873_v17, %v321_v15  ;;  %14 = vst [vmem:[#allocation2] sm:$0x1] %v13_v8 }
 0x29f   :  { %414 = vadd.xlane.f32.xlu1 %v413_v38  ;;  %411 = vadd.xlane.f32.xlu0 %v410_v39  ;;  %v1387_v38 = vld [vmem:[%s1534_s4 + $0x30] sm:$0xff]  ;;  %v881_v39 = vrot.slane %v801_v27, %v1242_v60  ;;  %v1393_v43 = vsub.s32 4, %v1234_v53 }
 0x2a0   :  { %v918_v62 = vadd.f32 %v917_v51, %v903_v48  ;;  %v324_v47 = vunpack.c.l.bf16 %v1387_v38  ;;  %v809_v48 = vrot.slane %v1368_v25, %v1245_v55  ;;  %v885_v51 = vrot.slane %v805_v34, %v1242_v60  ;;  %v1415_v55 = vld [vmem:[%s1534_s4 + $0x38] sm:$0xff] }
 0x2a1   :  { %v1054_v58 = vpop.eup %1053 }
 0x2a2   :  { %v711_v0 = vmul.f32 %v1054_v58, %v1227_v20  ;;  %v710_v2 = vmul.f32 %v1054_v58, %v1223_v12  ;;  %v919_v9 = vadd.f32 %v918_v62, %v904_v57  ;;  %v797_v20 = vrot.slane %v1325_v45, %v1250_v63  ;;  %v1357_v12 = vld [vmem:[%s1534_s4 + $0x28] sm:$0xff] }
 0x2a3   :  { %v322_v23 = vunpack.c.l.bf16 %v1357_v12  ;;  %v323_v33 = vunpack.c.h.bf16 %v1357_v12  ;;  %v458_v58 = vrot.slane %v1239_v59, %v1376_v31  ;;  %v325_v62 = vunpack.c.h.bf16 %v1387_v38 }
 0x2a4   :  { %v713_v42 = vmul.f32 %v711_v0, %v303_v30  ;;  %v712_v10 = vmul.f32 %v710_v2, %v302_v11  ;;  %v920_v30 = vadd.f32 %v919_v9, %v905_v7  ;;  %v877_v28 = vrot.slane %v797_v20, %v1242_v60 }
 0x2a5   :  { %v909_v57 = vmul.f32 %v881_v39, %v323_v33  ;;  %v813_v0 = vrot.slane %v1368_v25, %v1250_v63  ;;  %v889_v2 = vrot.slane %v809_v48, %v1242_v60  ;;  %v910_v4 = vmul.f32 %v885_v51, %v324_v47 }
 0x2a6   :  { %v717_v11 = vsel %vm387_vm5, %v713_v42, 0.0  ;;  %v714_v22 = vsel %vm387_vm5, %v712_v10, 0.0  ;;  %v921_v37 = vadd.f32 %v920_v30, %v906_v19  ;;  %v908_v41 = vmul.f32 %v877_v28, %v322_v23 }
 0x2a7   :  { %718 = vadd.xlane.f32.xlu1 %v717_v11  ;;  %715 = vadd.xlane.f32.xlu0 %v714_v22  ;;  %v462_v7 = vrot.slane %v1239_v59, %v1393_v43  ;;  %v326_v9 = vunpack.c.l.bf16 %v1415_v55  ;;  %v817_v42 = vrot.slane %v1368_v25, %v1269_v18  ;;  %v893_v63 = vrot.slane %v813_v0, %v1242_v60 }
 0x2a8   :  { %v922_v54 = vadd.f32 %v921_v37, %v907_v29  ;;  %v466_v10 = vrot.slane %v1239_v59, %v1396_v46  ;;  %v911_v20 = vmul.f32 %v889_v2, %v325_v62  ;;  %v534_v19 = vrot.slane %v454_v56, %v1360_v16 }
 0x2a9   :  { %v538_v30 = vrot.slane %v458_v58, %v1360_v16  ;;  %v327_v11 = vunpack.c.h.bf16 %v1415_v55  ;;  %v897_v22 = vrot.slane %v817_v42, %v1242_v60  ;;  %v912_v18 = vmul.f32 %v893_v63, %v326_v9 }
 0x2aa   :  { %v923_v6 = vadd.f32 %v922_v54, %v908_v41  ;;  %v470_v28 = vrot.slane %v1274_v5, %v1360_v16  ;;  %v542_v59 = vrot.slane %v462_v7, %v1360_v16  ;;  %v474_v29 = vrot.slane %v1274_v5, %v1376_v31 }
 0x2ab   :  { %v546_v8 = vrot.slane %v466_v10, %v1360_v16  ;;  %v913_v34 = vmul.f32 %v897_v22, %v327_v11  ;;  %v595_v39 = vmul.f32 %v534_v19, %v312_v36  ;;  %v596_v60 = vmul.f32 %v538_v30, %v313_v1 }
 0x2ac   :  { %v924_v17 = vadd.f32 %v923_v6, %v909_v57  ;;  %v478_v48 = vrot.slane %v1274_v5, %v1393_v43  ;;  %v550_v51 = vrot.slane %v470_v28, %v1360_v16  ;;  %v597_v54 = vmul.f32 %v542_v59, %v314_v13 }
 0x2ad   :  { %v482_v56 = vrot.slane %v1274_v5, %v1396_v46  ;;  %v554_v58 = vrot.slane %v474_v29, %v1360_v16  ;;  %v598_v36 = vmul.f32 %v546_v8, %v315_v14  ;;  %v611_v26 = vadd.f32 %v596_v60, %v595_v39 }
 0x2ae   :  { %v925_v27 = vadd.f32 %v924_v17, %v910_v4  ;;  %v486_v1 = vrot.slane %v1325_v45, %v1360_v16  ;;  %v558_v0 = vrot.slane %v478_v48, %v1360_v16  ;;  %v599_v2 = vmul.f32 %v550_v51, %v316_v24 }
 0x2af   :  { %v612_v13 = vadd.f32 %v611_v26, %v597_v54  ;;  %v490_v5 = vrot.slane %v1325_v45, %v1376_v31  ;;  %v562_v4 = vrot.slane %v482_v56, %v1360_v16  ;;  %v600_v3 = vmul.f32 %v554_v58, %v317_v32  ;;  %v423_v56 = vld [vmem:[#allocation2] sm:$0x1] }
 0x2b0   :  { %v926_v37 = vadd.f32 %v925_v27, %v911_v20  ;;  %v494_v6 = vrot.slane %v1325_v45, %v1393_v43  ;;  %v566_v7 = vrot.slane %v486_v1, %v1360_v16  ;;  %v601_v42 = vmul.f32 %v558_v0, %v318_v44 }
 0x2b1   :  { %v613_v14 = vadd.f32 %v612_v13, %v598_v36  ;;  %v498_v24 = vrot.slane %v1325_v45, %v1396_v46  ;;  %v570_v10 = vrot.slane %v490_v5, %v1360_v16  ;;  %v602_v20 = vmul.f32 %v562_v4, %v319_v52  ;;  %v727_v5 = vld [vmem:[#allocation2] sm:$0x1] }
 0x2b2   :  { %v927_v41 = vadd.f32 %v926_v37, %v912_v18  ;;  %v502_v32 = vrot.slane %v1368_v25, %v1360_v16  ;;  %v574_v17 = vrot.slane %v494_v6, %v1360_v16  ;;  %v603_v19 = vmul.f32 %v566_v7, %v320_v35 }
 0x2b3   :  { %v614_v63 = vadd.f32 %v613_v14, %v599_v2  ;;  %v506_v44 = vrot.slane %v1368_v25, %v1376_v31  ;;  %v578_v45 = vrot.slane %v498_v24, %v1360_v16  ;;  %v604_v22 = vmul.f32 %v570_v10, %v321_v15 }
 0x2b4   :  { %v928_v57 = vadd.f32 %v927_v41, %v913_v34  ;;  %v510_v52 = vrot.slane %v1368_v25, %v1393_v43  ;;  %v582_v18 = vrot.slane %v502_v32, %v1360_v16  ;;  %v605_v27 = vmul.f32 %v574_v17, %v322_v23 }
 0x2b5   :  { %v615_v21 = vadd.f32 %v614_v63, %v600_v3  ;;  %v514_v35 = vrot.slane %v1368_v25, %v1396_v46  ;;  %v586_v31 = vrot.slane %v506_v44, %v1360_v16  ;;  %v606_v59 = vmul.f32 %v578_v45, %v323_v33 }
 0x2b6   :  { %929 = vadd.xlane.f32.xlu1 %v928_v57  ;;  %v590_v15 = vrot.slane %v510_v52, %v1360_v16  ;;  %v607_v43 = vmul.f32 %v582_v18, %v324_v47  ;;  %v331_v32 = vand.u32 127, %v328_v50 }
 0x2b7   :  { %v616_v30 = vadd.f32 %v615_v21, %v601_v42  ;;  %v594_v8 = vrot.slane %v514_v35, %v1360_v16  ;;  %v608_v23 = vmul.f32 %v586_v31, %v325_v62 }
 0x2b8   :  { %v609_v25 = vmul.f32 %v590_v15, %v326_v9  ;;  %vm332_vm8 = vcmp.eq.s32.totalorder %v1234_v53, %v331_v32 }
 0x2b9   :  { %v617_v40 = vadd.f32 %v616_v30, %v602_v20  ;;  %v610_v37 = vmul.f32 %v594_v8, %v327_v11  ;;  %v959_v17 = vsel %vm332_vm8, 1.0, %v1063_v49  ;;  %v637_v49 = vld [vmem:[%s1538_s5] sm:$0x1] }
 0x2ba   :  { %v939_v8 = vld [vmem:[%s1538_s5] sm:$0x1] }
 0x2bb   :  { %v618_v28 = vadd.f32 %v617_v40, %v603_v19 }
 0x2bd   :  { %v619_v61 = vadd.f32 %v618_v28, %v604_v22 }
 0x2bf   :  { %v620_v29 = vadd.f32 %v619_v61, %v605_v27 }
 0x2c1   :  { %v621_v34 = vadd.f32 %v620_v29, %v606_v59 }
 0x2c3   :  { %v622_v46 = vadd.f32 %v621_v34, %v607_v43 }
 0x2c5   :  { %v623_v12 = vadd.f32 %v622_v46, %v608_v23 }
 0x2c7   :  { %v624_v33 = vadd.f32 %v623_v12, %v609_v25 }
 0x2c9   :  { %v625_v39 = vadd.f32 %v624_v33, %v610_v37 }
 0x2cb   :  { %626 = vadd.xlane.f32.xlu0 %v625_v39 }
 0x328   :  { %v412_v47 = vpop.xlane.xlu0 %411  ;;  %v415_v60 = vpop.xlane.xlu1 %414 }
 0x329   :  { %v416_v41 = vadd.f32 %v415_v60, %v412_v47 }
 0x32b   :  { %v417_v38 = vrot.slane %v416_v41, 4 }
 0x32d   :  { %v418_v62 = vadd.f32 %v417_v38, %v416_v41 }
 0x32f   :  { %v419_v48 = vrot.slane %v418_v62, 2 }
 0x330   :  { %v716_v55 = vpop.xlane.xlu0 %715  ;;  %v719_v9 = vpop.xlane.xlu1 %718 }
 0x331   :  { %v420_v51 = vadd.f32 %v419_v48, %v418_v62  ;;  %v720_v54 = vadd.f32 %v719_v9, %v716_v55 }
 0x333   :  { %v421_v11 = vrot.slane %v420_v51, 1  ;;  %v721_v57 = vrot.slane %v720_v54, 4 }
 0x335   :  { %v422_v58 = vadd.f32 %v421_v11, %v420_v51  ;;  %v722_v36 = vadd.f32 %v721_v57, %v720_v54 }
 0x337   :  { %v424_v26 = vadd.f32 %v423_v56, %v422_v58  ;;  %v723_v1 = vrot.slane %v722_v36, 2 }
 0x339   :  { %v961_v0 = vmul.f32 -1.442695, %v424_v26  ;;  %v724_v2 = vadd.f32 %v723_v1, %v722_v36 }
 0x33b   :  { %1055 = vpow2.f32 %v961_v0  ;;  %v725_v13 = vrot.slane %v724_v2, 1 }
 0x33d   :  { %v726_v4 = vadd.f32 %v725_v13, %v724_v2 }
 0x33f   :  { %v728_v3 = vadd.f32 %v727_v5, %v726_v4  ;;  %v930_v22 = vpop.xlane.xlu1 %929 }
 0x340   :  { %v931_v52 = vmul.f32 %v959_v17, %v930_v22 }
 0x341   :  { %v963_v14 = vmul.f32 -1.442695, %v728_v3 }
 0x342   :  { %v932_v27 = vsel %vm629_vm9, %v931_v52, 0.0 }
 0x343   :  { %1057 = vpow2.f32 %v963_v14  ;;  %v933_v28 = vrot.slane %v932_v27, 4 }
 0x348   :  { %v1056_v6 = vpop.eup %1055 }
 0x349   :  { %v428_v7 = vadd.f32 1.0, %v1056_v6 }
 0x34b   :  { %1059 = vrcp.f32 %v428_v7 }
 0x350   :  { %v1058_v42 = vpop.eup %1057 }
 0x351   :  { %v732_v63 = vadd.f32 1.0, %v1058_v42 }
 0x353   :  { %1061 = vrcp.f32 %v732_v63 }
 0x354   :  { %v627_v19 = vpop.xlane.xlu0 %626 }
 0x355   :  { %v628_v30 = vmul.f32 %v959_v17, %v627_v19 }
 0x357   :  { %v630_v44 = vsel %vm629_vm9, %v628_v30, 0.0 }
 0x358   :  { %v1060_v24 = vpop.eup %1059  ;;  %v631_v45 = vrot.slane %v630_v44, 4 }
 0x359   :  { %v435_v10 = vrot.slane %v1060_v24, %v1360_v16 }
 0x35a   :  { %v632_v40 = vadd.f32 %v631_v45, %v630_v44 }
 0x35b   :  { %436 = vrot.lane.b32.xlu0 %v435_v10, %s1065_s21 }
 0x35c   :  { %v633_v18 = vrot.slane %v632_v40, 2 }
 0x35e   :  { %v634_v35 = vadd.f32 %v633_v18, %v632_v40 }
 0x360   :  { %v1062_v20 = vpop.eup %1061  ;;  %v635_v31 = vrot.slane %v634_v35, 1 }
 0x361   :  { %v739_v21 = vrot.slane %v1062_v20, %v1360_v16  ;;  %v934_v16 = vadd.f32 %v933_v28, %v932_v27 }
 0x362   :  { %v636_v50 = vadd.f32 %v635_v31, %v634_v35 }
 0x363   :  { %740 = vrot.lane.b32.xlu1 %v739_v21, %s1065_s21  ;;  %v935_v59 = vrot.slane %v934_v16, 2 }
 0x364   :  { %v638_v61 = vadd.f32 %v637_v49, %v636_v50 }
 0x365   :  { %v936_v53 = vadd.f32 %v935_v59, %v934_v16 }
 0x367   :  { %v937_v43 = vrot.slane %v936_v53, 1 }
 0x369   :  { %v938_v29 = vadd.f32 %v937_v43, %v936_v53 }
 0x36b   :  { %v940_v23 = vadd.f32 %v939_v8, %v938_v29 }
 0x3cd   :  { %v437_v15 = vpop.permute.xlu0 %436 }
 0x3ce   :  { %440 = vst.msk [vmem:[%s1537_s8] sm:$0x1] %vm439_vm10, %v437_v15 }
 0x3cf   :  { %640 = vst.msk [vmem:[%s1537_s8] sm:$0x1] %vm639_vm11, %v638_v61 }
 0x3d5   :  { %v741_v34 = vpop.permute.xlu1 %740 }
 0x3d6   :  { %743 = vst.msk [vmem:[%s1537_s8 + $0x1] sm:$0x1] %vm439_vm10, %v741_v34 }
 0x3d7   :  { %941 = vst.msk [vmem:[%s1537_s8 + $0x1] sm:$0x1] %vm639_vm11, %v940_v23 }

</bundles_post_ra>
